<compile_context>
chip_gen: v7x
topology: tpu7x:2x2x1
jax: 0.10.0
libtpu: 0.0.40
codegen_flags: <defaults>
</compile_context>

<pallas_src>
import functools
import math

import jax
import jax.numpy as jnp
from jax.experimental import pallas as pl
from jax.experimental.pallas import tpu as pltpu

LANE = 128
_MIB = 1024 * 1024
_ROW_TARGET = 512          # sublane-axis block target (multiple of 8/16/32)
_COL_TARGET = 1024         # minimum lane-axis block target (multiple of 128)
_SPLIT_BYTES = 2 * _MIB    # slabs above this get >=2 grid blocks (megacore)


# ---------------------------------------------------------------------------
# Kernels
# ---------------------------------------------------------------------------
def _mul_kernel(x_ref, m_ref, o_ref):
    # One VMEM tile.  m_ref is a (tr,tc)/(tr,1)/(1,tc)/(1,1) 2-D tile or a
    # (tr,1,tc) 3-D tile: jnp broadcasting performs the in-register broadcast;
    # the cast to the promoted output dtype is a no-op when dtypes match.
    o_ref[...] = x_ref[...].astype(o_ref.dtype) * m_ref[...].astype(o_ref.dtype)


def _scalar_mul_kernel(m_ref, x_ref, o_ref):
    # m_ref is a (1,)-shaped SMEM scalar: splat in-register, no multiplier DMA.
    o_ref[...] = x_ref[...].astype(o_ref.dtype) * m_ref[0].astype(o_ref.dtype)


# ---------------------------------------------------------------------------
# Generation-aware budgets and block planning
# ---------------------------------------------------------------------------
@functools.lru_cache(maxsize=1)
def _vmem_budget():
    """(per-operand block byte budget, scoped-VMEM limit), generation aware.

    v5e stays at 2 MiB blocks / 16 MiB scoped limit (its default); v6e/v7x get
    4 MiB blocks with the scoped limit capped at 32 MiB (== the v6e/v7x default
    and half of v7x's 64 MiB physical VMEM, so no OOM / degenerate windows).
    """
    cap = None
    try:
        cap = int(pltpu.get_tpu_info().vmem_capacity_bytes)
    except Exception:
        cap = None
    kind = ""
    try:
        kind = jax.devices()[0].device_kind.lower()
    except Exception:
        pass
    is_v5e = any(t in kind for t in ("v5 lite", "v5lite", "v5e"))
    if is_v5e:
        return 2 * _MIB, 16 * _MIB
    if cap is None:
        if kind and ("v6" in kind or "v7" in kind or "7x" in kind):
            return 4 * _MIB, 32 * _MIB
        return 2 * _MIB, 16 * _MIB          # unknown part: conservative
    return 4 * _MIB, min(32 * _MIB, max(16 * _MIB, cap // 2))


def _sublane_granule(dtype) -> int:
    itemsize = jnp.dtype(dtype).itemsize
    if itemsize >= 4:
        return 8
    if itemsize == 2:
        return 16
    return 32


def _pick_block(dim: int, target: int, granule: int) -> int:
    """Largest layout-valid block extent <= target for an axis of length dim."""
    if dim <= target:
        return dim                                   # full extent: always valid
    return max(granule, (target // granule) * granule)


def _plan_2d(R, C, granule, itemsize, block_bytes):
    """Lane-dense, byte-budgeted (tr, tc); guarantees >=2 grid blocks for slabs
    big enough that both v7x TensorCores should stream."""
    tr = _pick_block(R, _ROW_TARGET, granule)
    col_target = max(_COL_TARGET,
                     (block_bytes // max(tr * itemsize, 1)) // LANE * LANE)
    tc = _pick_block(C, col_target, LANE)
    # If the lane axis came out narrow (small C), regrow the sublane axis so
    # the block still hits the byte budget (bigger DMAs, fewer grid steps).
    row_target = max(_ROW_TARGET,
                     (block_bytes // max(tc * itemsize, 1)) // granule * granule)
    tr = _pick_block(R, row_target, granule)
    # Megacore: a (1,1) grid pins an HBM-bound stream to one TensorCore.
    if (pl.cdiv(R, tr) * pl.cdiv(C, tc) == 1
            and R * C * itemsize > _SPLIT_BYTES):
        if R >= 2 * granule:
            tr = max(granule, (R // 2) // granule * granule)
        elif C >= 2 * LANE:
            tc = max(LANE, (C // 2) // LANE * LANE)
    return tr, tc


# ---------------------------------------------------------------------------
# Tiled multiplies
# ---------------------------------------------------------------------------
def _tiled_mul_2d(x2d: jax.Array, m2d: jax.Array, out_dtype) -> jax.Array:
    """out = x2d * m2d where m2d is (R,C), (R,1), (1,C) or (1,1)."""
    R, C = x2d.shape
    rm, cm = m2d.shape
    block_bytes, vmem_limit = _vmem_budget()
    granule = max(_sublane_granule(d) for d in (x2d.dtype, m2d.dtype, out_dtype))
    itemsize = max(jnp.dtype(x2d.dtype).itemsize, jnp.dtype(out_dtype).itemsize)
    tr, tc = _plan_2d(R, C, granule, itemsize, block_bytes)
    grid = (pl.cdiv(R, tr), pl.cdiv(C, tc))

    x_spec = pl.BlockSpec((tr, tc), lambda i, j: (i, j))
    m_item = jnp.dtype(m2d.dtype).itemsize
    if rm == 1 and cm == 1:
        m_spec = pl.BlockSpec((1, 1), lambda i, j: (0, 0)); m_blk = m_item
    elif cm == 1:
        m_spec = pl.BlockSpec((tr, 1), lambda i, j: (i, 0)); m_blk = tr * m_item
    elif rm == 1:
        m_spec = pl.BlockSpec((1, tc), lambda i, j: (0, j)); m_blk = tc * m_item
    else:
        m_spec = x_spec; m_blk = tr * tc * m_item

    vmem_need = 2 * (tr * tc * (jnp.dtype(x2d.dtype).itemsize
                                + jnp.dtype(out_dtype).itemsize)
                     + m_blk) + 2 * _MIB
    return pl.pallas_call(
        _mul_kernel,
        out_shape=jax.ShapeDtypeStruct((R, C), out_dtype),
        grid_spec=pltpu.PrefetchScalarGridSpec(
            num_scalar_prefetch=0, grid=grid,
            in_specs=[x_spec, m_spec], out_specs=x_spec),
        compiler_params=pltpu.CompilerParams(
            dimension_semantics=("parallel", "parallel"),
            vmem_limit_bytes=int(max(vmem_limit, vmem_need))),
    )(x2d, m2d)


def _tiled_mul_scalar(x2d: jax.Array, m1: jax.Array, out_dtype) -> jax.Array:
    """out = x2d * scalar; the scalar lives in SMEM and is splatted in-kernel."""
    R, C = x2d.shape
    block_bytes, vmem_limit = _vmem_budget()
    granule = max(_sublane_granule(x2d.dtype), _sublane_granule(out_dtype))
    itemsize = max(jnp.dtype(x2d.dtype).itemsize, jnp.dtype(out_dtype).itemsize)
    tr, tc = _plan_2d(R, C, granule, itemsize, block_bytes)
    grid = (pl.cdiv(R, tr), pl.cdiv(C, tc))
    x_spec = pl.BlockSpec((tr, tc), lambda i, j: (i, j))
    vmem_need = 2 * tr * tc * (jnp.dtype(x2d.dtype).itemsize
                               + jnp.dtype(out_dtype).itemsize) + 2 * _MIB
    return pl.pallas_call(
        _scalar_mul_kernel,
        out_shape=jax.ShapeDtypeStruct((R, C), out_dtype),
        grid_spec=pltpu.PrefetchScalarGridSpec(
            num_scalar_prefetch=0, grid=grid,
            in_specs=[pl.BlockSpec(memory_space=pltpu.MemorySpace.SMEM), x_spec],
            out_specs=x_spec),
        compiler_params=pltpu.CompilerParams(
            dimension_semantics=("parallel", "parallel"),
            vmem_limit_bytes=int(max(vmem_limit, vmem_need))),
    )(m1, x2d)


def _tiled_mul_3d(x3: jax.Array, m3: jax.Array, out_dtype) -> jax.Array:
    """out = x3 * m3 with x3:(R,M,C), m3:(R,1,C).  The multiplier is replayed
    along the middle (broadcast) axis by the index_map, never materialized."""
    R, M, C = x3.shape
    block_bytes, vmem_limit = _vmem_budget()
    granule = max(_sublane_granule(d) for d in (x3.dtype, m3.dtype, out_dtype))
    itemsize = max(jnp.dtype(x3.dtype).itemsize, jnp.dtype(out_dtype).itemsize)

    tc = _pick_block(C, max(_COL_TARGET,
                            (block_bytes // (granule * itemsize)) // LANE * LANE),
                     LANE)
    rows_budget = max(granule, block_bytes // max(tc * itemsize, 1))
    tm = _pick_block(M, max(granule, min(_ROW_TARGET, rows_budget)), granule)
    tr = max(1, min(R, block_bytes // max(tm * tc * itemsize, 1)))
    # Megacore: guarantee >=2 blocks for big slabs (R >= 2 in this pattern).
    if (pl.cdiv(R, tr) * pl.cdiv(M, tm) * pl.cdiv(C, tc) == 1
            and R * M * C * itemsize > _SPLIT_BYTES):
        tr = max(1, R // 2)

    # Middle axis iterates fastest: the multiplier block index only changes
    # when the (row-band, col-block) pair changes, minimizing its re-DMA.
    grid = (pl.cdiv(R, tr), pl.cdiv(C, tc), pl.cdiv(M, tm))
    x_spec = pl.BlockSpec((tr, tm, tc), lambda i, k, j: (i, j, k))
    m_spec = pl.BlockSpec((tr, 1, tc), lambda i, k, j: (i, 0, k))
    vmem_need = (2 * tr * tm * tc * (jnp.dtype(x3.dtype).itemsize
                                     + jnp.dtype(out_dtype).itemsize)
                 + 2 * tr * tc * jnp.dtype(m3.dtype).itemsize + 2 * _MIB)
    return pl.pallas_call(
        _mul_kernel,
        out_shape=jax.ShapeDtypeStruct((R, M, C), out_dtype),
        grid_spec=pltpu.PrefetchScalarGridSpec(
            num_scalar_prefetch=0, grid=grid,
            in_specs=[x_spec, m_spec], out_specs=x_spec),
        compiler_params=pltpu.CompilerParams(
            dimension_semantics=("parallel", "parallel", "parallel"),
            vmem_limit_bytes=int(max(vmem_limit, vmem_need))),
    )(x3, m3)


# ---------------------------------------------------------------------------
# Shape plumbing
# ---------------------------------------------------------------------------
def _as_2d(arr: jax.Array) -> jax.Array:
    """View arr as a lane-dense 2-D slab (metadata-only reshape, no copy)."""
    n = arr.size
    best = None
    # Prefer a column count that is a multiple of 128 (unmasked full-width
    # stores); among those, the widest that still gives >= 8 rows.
    for c in range(4096, LANE - 1, -LANE):
        if n % c == 0:
            if n // c >= 8:
                return arr.reshape(n // c, c)
            if best is None:
                best = c
    if best is not None:
        return arr.reshape(n // best, best)
    # No lane-dense factorization exists (e.g. n odd): fall back to the natural
    # trailing dim; ragged lanes are handled by masked stores (tiny tensors).
    if arr.ndim >= 2:
        return arr.reshape(-1, arr.shape[-1])
    return arr.reshape(1, n)


def _scalar_mul(a: jax.Array, b: jax.Array, out_dtype) -> jax.Array:
    """Scalar multiplier: pass it through SMEM, splat in-kernel."""
    x2d = _as_2d(a)
    if jnp.issubdtype(b.dtype, jnp.floating):
        return _tiled_mul_scalar(x2d, b.reshape((1,)).astype(jnp.float32),
                                 out_dtype)
    if jnp.issubdtype(b.dtype, jnp.integer) or jnp.issubdtype(b.dtype, jnp.bool_):
        return _tiled_mul_scalar(x2d, b.reshape((1,)).astype(jnp.int32),
                                 out_dtype)
    # TODO(synk): exotic scalar dtypes fall back to a (1, cols) VMEM row splat.
    m2d = jnp.broadcast_to(b.reshape(1, 1), (1, x2d.shape[1]))
    return _tiled_mul_2d(x2d, m2d, out_dtype)


def dmx_mul(x, multiplier):
    """Pallas-backed Mul._forward: input * multiplier with broadcasting.

    The DmxModule input/output casts default to Same() (identity), so this is
    the complete forward pass.  Output dtype follows jnp.result_type on the
    original operands (weak-type aware, so bf16 tensor * Python float -> bf16).
    """
    out_dtype = jnp.result_type(x, multiplier)
    a = jnp.asarray(x)
    b = jnp.asarray(multiplier)
    out_shape = jnp.broadcast_shapes(a.shape, b.shape)
    n = math.prod(out_shape)

    if n == 0 or len(out_shape) == 0:
        return (a * b).astype(out_dtype)        # degenerate: no kernel needed

    nd = len(out_shape)
    a_shape = (1,) * (nd - a.ndim) + a.shape
    b_shape = (1,) * (nd - b.ndim) + b.shape
    # Multiplication commutes: make `a` the full-(output)-shaped operand.
    if a_shape != out_shape and b_shape == out_shape:
        a, b = b, a
        a_shape, b_shape = b_shape, a_shape
    a = a.reshape(a_shape)
    b = b.reshape(b_shape)

    if a_shape == out_shape:
        # Collapse output axes (extent > 1) into contiguous runs of "matched"
        # (multiplier covers the axis) vs "broadcast" (multiplier is size 1).
        runs = []                                # [is_matched, run_size]
        for i in range(nd):
            if out_shape[i] == 1:
                continue
            matched = b_shape[i] == out_shape[i]
            if runs and runs[-1][0] == matched:
                runs[-1][1] *= out_shape[i]
            else:
                runs.append([matched, out_shape[i]])
        pattern = tuple(r[0] for r in runs)
        sizes = tuple(r[1] for r in runs)

        if pattern == ():                        # single-element output
            return (a * b).astype(out_dtype).reshape(out_shape)

        if pattern == (False,):                  # scalar multiplier (SMEM path)
            return _scalar_mul(a, b, out_dtype).reshape(out_shape)

        if pattern == (True,):                   # same-shape elementwise
            x2d = _as_2d(a)
            return _tiled_mul_2d(x2d, b.reshape(x2d.shape),
                                 out_dtype).reshape(out_shape)

        if pattern == (True, False):             # per-row (leading) scale,
            rows, cols = sizes                   # e.g. x:[N,C,H,W]*m:[N,C,1,1]
            return _tiled_mul_2d(a.reshape(rows, cols), b.reshape(rows, 1),
                                 out_dtype).reshape(out_shape)

        if pattern == (False, True):             # per-column (trailing) scale,
            rows, cols = sizes                   # e.g. x:[B,S,D]*m:[D]
            return _tiled_mul_2d(a.reshape(rows, cols), b.reshape(1, cols),
                                 out_dtype).reshape(out_shape)

        if pattern == (False, True, False):      # channel scale, e.g.
            lead, mid, cols = sizes              # x:[N,C,H,W]*m:[1,C,1,1]
            if cols >= LANE and cols % LANE == 0:
                # Lane-dense trailing dims: (N*C, H*W) x column (N*C, 1).
                m2d = jnp.broadcast_to(b.reshape(1, mid, 1),
                                       (lead, mid, 1)).reshape(lead * mid, 1)
                return _tiled_mul_2d(a.reshape(lead * mid, cols), m2d,
                                     out_dtype).reshape(out_shape)
            # H*W below 128 / ragged (e.g. 49): masked partial stores would
            # dominate.  Re-fold lane-dense as (N, C*H*W) x row (1, C*H*W):
            # only C*H*W multiplier values materialize (still tiny).
            m2d = jnp.broadcast_to(b.reshape(1, mid, 1),
                                   (1, mid, cols)).reshape(1, mid * cols)
            return _tiled_mul_2d(a.reshape(lead, mid * cols), m2d,
                                 out_dtype).reshape(out_shape)

        if pattern == (True, False, True):       # e.g. x:[N,C,H,W]*m:[N,1,H,W]
            lead, mid, cols = sizes              # 3-D grid, m never materialized
            return _tiled_mul_3d(a.reshape(lead, mid, cols),
                                 b.reshape(lead, 1, cols),
                                 out_dtype).reshape(out_shape)

    # TODO(synk): >=4 alternating matched/broadcast runs (e.g. m:[1,C,1,W]) or
    # both operands partially broadcast still materialize the broadcasts at
    # full size here; rare for Mul in practice.
    x2d = _as_2d(jnp.broadcast_to(a, out_shape))
    m2d = _as_2d(jnp.broadcast_to(b, out_shape))
    return _tiled_mul_2d(x2d, m2d, out_dtype).reshape(out_shape)


# ---------------------------------------------------------------------------
# Self-test
# ---------------------------------------------------------------------------
if __name__ == "__main__":
    key = jax.random.PRNGKey(0)
    ks = list(jax.random.split(key, 10))

    def _check(name, x, m, rtol=1e-6, atol=1e-6):
        out = jax.block_until_ready(dmx_mul(x, m))
        ref = jnp.multiply(x, m)
        assert out.shape == ref.shape, (name, out.shape, ref.shape)
        assert out.dtype == ref.dtype, (name, out.dtype, ref.dtype)
        assert bool(jnp.allclose(out, ref, rtol=rtol, atol=atol)), name

    # 1) Canonical NCHW channel scale (lane-dense H*W).
    x = jax.random.normal(ks[0], (2, 4, 16, 16), dtype=jnp.float32)
    _check("channel_scale", x,
           jax.random.normal(ks[1], (1, 4, 1, 1), dtype=jnp.float32))

    # 2) Channel scale with ragged H*W (7*7 = 49): lane-dense row re-fold path.
    x2 = jax.random.normal(ks[2], (2, 4, 7, 7), dtype=jnp.float32)
    _check("channel_scale_ragged", x2,
           jax.random.normal(ks[1], (1, 4, 1, 1), dtype=jnp.float32))

    # 3) Same-shape elementwise multiply.
    _check("elementwise", x,
           jax.random.normal(ks[3], (2, 4, 16, 16), dtype=jnp.float32))

    # 4) Python-float scalar on a bf16 input (weak type: stays bf16; SMEM path).
    xb = jax.random.normal(ks[4], (2, 8, 32), dtype=jnp.bfloat16)
    _check("py_scalar_bf16", xb, 1.7, rtol=2e-2, atol=2e-2)

    # 5) 0-d jnp scalar multiplier (SMEM path).
    _check("jnp_scalar", x, jnp.float32(0.37))

    # 6) Trailing-dim multiplier (per-hidden scale).
    xs = jax.random.normal(ks[5], (2, 8, 32), dtype=jnp.float32)
    _check("row_scale", xs, jax.random.normal(ks[6], (32,), dtype=jnp.float32))

    # 7) Leading-dims multiplier (per-(N,C) scale).
    _check("col_scale", x,
           jax.random.normal(ks[7], (2, 4, 1, 1), dtype=jnp.float32))

    # 8) Mixed broadcast (matched, broadcast, matched): 3-D grid path.
    _check("mixed_3d", x,
           jax.random.normal(ks[8], (2, 1, 16, 16), dtype=jnp.float32))

    # 9) >=4 alternating runs: materializing fallback (rare).
    _check("fallback_4runs",
           jax.random.normal(ks[9], (2, 4, 8, 16), dtype=jnp.float32),
           jax.random.normal(ks[0], (1, 4, 1, 16), dtype=jnp.float32))

    # 10) Slab big enough to exercise the >=2-block megacore split and the
    #     byte-budgeted lane-wide tiling (8*64*32*64 f32 = 4 MiB).
    xl = jax.random.normal(ks[1], (8, 64, 32, 64), dtype=jnp.float32)
    _check("megacore_split", xl,
           jax.random.normal(ks[2], (1, 64, 1, 1), dtype=jnp.float32))

    print("KERNEL_OK")
</pallas_src>

<mosaic_0001>
module attributes {stable_mosaic.version = 11 : i64} {
  func.func @_mul_kernel(%arg0: i32, %arg1: i32, %arg2: memref<8x256xf32, #tpu.memory_space<vmem>>, %arg3: memref<8x1xf32, #tpu.memory_space<vmem>>, %arg4: memref<8x256xf32, #tpu.memory_space<vmem>>) attributes {dimension_semantics = [#tpu.dimension_semantics<parallel>, #tpu.dimension_semantics<parallel>], iteration_bounds = array<i64: 1, 1>, scalar_prefetch = 0 : i64, scratch_operands = 0 : i64, tpu.core_type = #tpu.core_type<tc>, window_params = [{transform_indices = @transform_0, window_bounds = array<i64: 8, 256>}, {transform_indices = @transform_1, window_bounds = array<i64: 8, 1>}, {transform_indices = @transform_2, window_bounds = array<i64: 8, 256>}]} {
    %c0 = arith.constant 0 : index
    %c0_0 = arith.constant 0 : index
    %0 = vector.load %arg2[%c0, %c0_0] : memref<8x256xf32, #tpu.memory_space<vmem>>, vector<8x256xf32>
    %c0_1 = arith.constant 0 : index
    %c0_2 = arith.constant 0 : index
    %1 = vector.load %arg3[%c0_1, %c0_2] : memref<8x1xf32, #tpu.memory_space<vmem>>, vector<8x1xf32>
    %2 = vector.broadcast %1 : vector<8x1xf32> to vector<8x256xf32>
    %3 = arith.mulf %0, %2 : vector<8x256xf32>
    %c0_3 = arith.constant 0 : index
    %c0_4 = arith.constant 0 : index
    %4 = vector.load %arg4[%c0_3, %c0_4] : memref<8x256xf32, #tpu.memory_space<vmem>>, vector<8x256xf32>
    tpu.vector_store %arg4[%c0_3, %c0_4], %3 {strides = array<i32>} : memref<8x256xf32, #tpu.memory_space<vmem>>, vector<8x256xf32>,
    return
  }
  func.func @transform_0(%arg0: i32, %arg1: i32) -> (i32, i32) {
    %c0_i32 = arith.constant 0 : i32
    return %arg0, %arg1 : i32, i32
  }
  func.func @transform_1(%arg0: i32, %arg1: i32) -> (i32, i32) {
    %c0_i32 = arith.constant 0 : i32
    %c0_i32_0 = arith.constant 0 : i32
    return %arg0, %c0_i32 : i32, i32
  }
  func.func @transform_2(%arg0: i32, %arg1: i32) -> (i32, i32) {
    %c0_i32 = arith.constant 0 : i32
    return %arg0, %arg1 : i32, i32
  }
}

</mosaic_0001>

<bundles_post_ra>
// kernel: tpu_custom_call.1
= control target key start
LH: loop header
LB: loop body
LE: loop exit
PB: predicated region body
PF: predicated region fallthrough
CT: control target
= control target key end

     0   :  { %7 = vsyncpa [#allocation3], 0  ;;  %s148_s0 = inlined_call_operand.hbm [shape: f32[8,256], index: 0, kind: input, shape index: {}]   ;;  %s149_s1 = inlined_call_operand.vmem [shape: f32[8,1], index: 1, kind: input, shape index: {}]   ;;  %s150_s2 = inlined_call_operand.hbm [shape: f32[8,256], index: 2, kind: output, shape index: {}]  }
   0x1   :  { %8 = vsyncpa [#allocation4], 0  ;;  %s103_s9 = smov [#allocation2]   ;;  %s55_s13 = scalar_lea.hbm %s148_s0, 256 }
   0x2   :  { %s15_s10 = sshll.u32 %s103_s9, 4  ;;  %p56_p0 = scmp.ne.s32.totalorder %s148_s0, %s55_s13  ;;  %s16_s10 = int_to_ptr.vmem [resolvable:$true] %s15_s10 }
   0x3   :  { %p59_p1 = scmp.lt.u32.totalorder %s55_s13, %s148_s0 }
   0x5   :  { %p61_p2 = pnand %p59_p1, %p56_p0 }
   0x7   :  { %64 = shalt.err (!%p61_p2)
}
   0x8   :  { %s65_s18 = scalar_lea.vmem %s16_s10, 256  ;;  %p70_p4 = scmp.lt.s32.totalorder %s16_s10, %s16_s10 }
   0x9   :  { %p66_p3 = scmp.ne.s32.totalorder %s16_s10, %s65_s18  ;;  %p71_p5 = scmp.lt.s32.totalorder %s65_s18, %s65_s18 }
   0xb   :  { %p72_p6 = por %p71_p5, %p70_p4 }
   0xd   :  { %p73_p7 = pnand %p72_p6, %p66_p3 }
   0xf   :  { %76 = shalt.err (!%p73_p7)
}
  0x10   :  { %18 = dma.hbm_to_vmem [thread:$0]  %s148_s0, 256, %s16_s10, [#allocation3]  }
  0x11   :  { %99 = dma.done.wait [#allocation3], 256  }
  0x12   :  { %100 = vsyncadd [#allocation3], 4294967040  ;;  %v104_v0 = vmov 0   ;;  %v26_v1 = vld [vmem:[%s149_s1] sm:$0xff]  ;;  %v25_v3 = vld [vmem:[#allocation2 + $0x8] sm:$0xff]  ;;  %s105_s23 = smov [#allocation5]  }
  0x13   :  { %54 = vset.pattern.permute.xlu0 %v104_v0  ;;  %v24_v2 = vld [vmem:[#allocation2] sm:$0xff]  ;;  %s42_s24 = sshll.u32 %s105_s23, 4  ;;  %s43_s24 = int_to_ptr.vmem [resolvable:$true] %s42_s24 }
  0x14   :  { %29 = vperm.xlu0 %54, %v26_v1   ;;  %s77_s0 = scalar_lea.vmem %s43_s24, 256  ;;  %p82_p9 = scmp.lt.s32.totalorder %s43_s24, %s43_s24 }
  0x15   :  { %p78_p8 = scmp.ne.s32.totalorder %s43_s24, %s77_s0  ;;  %p83_p10 = scmp.lt.s32.totalorder %s77_s0, %s77_s0 }
  0x17   :  { %p84_p11 = por %p83_p10, %p82_p9 }
  0x19   :  { %p85_p12 = pnand %p84_p11, %p78_p8 }
  0x93   :  { %v30_v4 = vpop.permute.xlu0 %29 }
  0x94   :  { %v32_v5 = vmul.f32 %v30_v4, %v24_v2  ;;  %v33_v6 = vmul.f32 %v30_v4, %v25_v3 }
  0x96   :  { %34 = vst [vmem:[#allocation5] sm:$0xff] %v32_v5  ;;  %35 = vst [vmem:[#allocation5 + $0x8] sm:$0xff] %v33_v6 }
  0x97   :  { %88 = shalt.err (!%p85_p12)
}
  0x98   :  { %s89_s26 = scalar_lea.hbm %s150_s2, 256 }
  0x99   :  { %p90_p13 = scmp.ne.s32.totalorder %s150_s2, %s89_s26  ;;  %p93_p0 = scmp.lt.u32.totalorder %s89_s26, %s150_s2 }
  0x9b   :  { %p95_p1 = pnand %p93_p0, %p90_p13 }
  0x9d   :  { %98 = shalt.err (!%p95_p1)
}
  0x9e   :  { %45 = dma.vmem_to_hbm [thread:$0]  %s43_s24, 256, %s150_s2, [#allocation4]  }
  0x9f   :  { %101 = dma.done.wait [#allocation4], 256  }
  0xa0   :  { %102 = vsyncadd [#allocation4], 4294967040 }
  0xa1   :  { %49 = vsyncpa [#allocation3], 1 }
  0xa2   :  { %50 = vsyncpa [#allocation4], 1 }

</bundles_post_ra>
